<compile_context>
chip_gen: v5e
topology: v5e:2x2
jax: 0.10.0
libtpu: 0.0.40
codegen_flags: <defaults>
</compile_context>

<pallas_src>
import numpy as np
import jax
import jax.numpy as jnp
from jax import lax
from jax.experimental import pallas as pl
from jax.experimental.pallas import tpu as pltpu


# ---------------------------------------------------------------------------
# Kernel bodies
# ---------------------------------------------------------------------------
def _hoaf_block(x, A, w, b, has_p1, out_dtype):
    """HOAF pow-2 math on one (C, N) tile.

    A is the (C, C) block-diagonal ones matrix (A[i, j] = 1 iff same group),
    so (A @ x)[c] is the group sum broadcast to every channel of the group.
    w, b are the folded (beta2 * conv2) scale / bias, shape (C, 1).
    """
    xf = x.astype(jnp.float32)
    s1 = jnp.dot(A, xf, preferred_element_type=jnp.float32,
                 precision=lax.Precision.HIGHEST)
    s2 = jnp.dot(A, xf * xf, preferred_element_type=jnp.float32,
                 precision=lax.Precision.HIGHEST)
    res = w * (0.5 * (s1 * s1 + s2)) + b        # sum_{i<=j} x_i x_j per group
    if has_p1:
        res = xf + res
    return res.astype(out_dtype)


def _make_spatial_kernel(has_p1):
    """Block = (1, C, tn): one batch element, tn lanes of flattened H*W."""
    def kernel(x_ref, a_ref, w_ref, b_ref, o_ref):
        o_ref[0] = _hoaf_block(x_ref[0], a_ref[...], w_ref[...], b_ref[...],
                               has_p1, o_ref.dtype)
    return kernel


def _make_batched_kernel(tb, has_p1):
    """Block = (tb, C, HW): fold tb batch elements per grid step (small H*W)."""
    def kernel(x_ref, a_ref, w_ref, b_ref, o_ref):
        A = a_ref[...]
        w = w_ref[...]
        b = b_ref[...]
        for i in range(tb):                     # static unroll; tb capped at 32
            o_ref[i] = _hoaf_block(x_ref[i], A, w, b, has_p1, o_ref.dtype)
    return kernel


# ---------------------------------------------------------------------------
# Host-side wrapper
# ---------------------------------------------------------------------------
def _vmem_limit_bytes():
    """Generation-aware scoped VMEM limit (v5e/v6e: 128 MiB phys, v7x: 64 MiB)."""
    try:
        phys = pltpu.get_tpu_info().vmem_capacity_bytes
    except Exception:
        phys = 64 << 20
    return int(min(phys // 2, 64 << 20))


def hoaf_v2_pallas(inp, conv2_w, conv2_b, beta2, *, num_groups,
                   num_pow=(1, 2), tile_lanes=None):
    """inp: [B, C, H, W] (NCHW, matching the PyTorch module), f32 or bf16."""
    B, C, H, W = inp.shape
    if C % num_groups != 0:
        raise ValueError("num_channels need to be divisible by num_groups")
    cg = C // num_groups
    HW = H * W
    has_p1 = 1 in num_pow
    has_p2 = 2 in num_pow

    # Trivial configurations: never launch a kernel (free 100% saving).
    if not has_p2:
        return inp if has_p1 else jnp.zeros_like(inp)

    dt = inp.dtype
    esize = np.dtype(dt).itemsize

    # NCHW -> (B, C, H*W): free reshape, native dtype (no host-side f32 copy).
    # Note: for bf16 I/O, C being a multiple of 16 gives the cleanest packing.
    x3d = inp.reshape(B, C, HW)

    # Effective conv2 params: due to the `idx` bug only in-channel 0 of each
    # group carries signal; beta2 is folded in here (kernel does w*S + b).
    beta_flat = beta2.reshape(C).astype(jnp.float32)
    w_eff = (beta_flat * conv2_w[:, 0, 0, 0].astype(jnp.float32)).reshape(C, 1)
    b_eff = (beta_flat * conv2_b.astype(jnp.float32)).reshape(C, 1)

    # Block-diagonal group-sum matrix.
    gid = np.arange(C) // cg
    A = jnp.asarray((gid[:, None] == gid[None, :]).astype(np.float32))

    vmem_limit = _vmem_limit_bytes()
    # 2 streams (in + out) x double buffering, 25% headroom for A/w/b/temps.
    max_block_bytes = (vmem_limit * 3 // 4) // 4
    target_block_bytes = int(min(4 << 20, max_block_bytes))

    slab_bytes = C * HW * esize                          # one batch element
    use_batch_fold = (B > 1) and (2 * slab_bytes <= target_block_bytes)

    cost = pl.CostEstimate(
        flops=int(B * HW * (4 * C * C + 8 * C)),
        transcendentals=0,
        bytes_accessed=int(2 * B * C * HW * esize + (C * C + 2 * C) * 4))

    common_specs = [
        pl.BlockSpec((C, C), lambda *_: (0, 0)),          # A (resident)
        pl.BlockSpec((C, 1), lambda *_: (0, 0)),          # beta2 * w[:, 0]
        pl.BlockSpec((C, 1), lambda *_: (0, 0)),          # beta2 * bias
    ]

    if use_batch_fold:
        tb = max(1, min(B, target_block_bytes // slab_bytes, 32))
        # Keep >=2 grid steps (two TensorCores on v7x) when blocks stay sizable.
        if pl.cdiv(B, tb) < 2 and B >= 2 and pl.cdiv(B, 2) * slab_bytes >= (64 << 10):
            tb = pl.cdiv(B, 2)
        grid = (pl.cdiv(B, tb),)
        kernel = _make_batched_kernel(tb, has_p1)
        in_spec_x = pl.BlockSpec((tb, C, HW), lambda n: (n, 0, 0))
        out_spec = pl.BlockSpec((tb, C, HW), lambda n: (n, 0, 0))
        dim_sem = ("parallel",)
    else:
        if tile_lanes is not None:
            tn = int(tile_lanes)
        elif HW <= 128:
            tn = HW
        else:
            tn = max(128, min(HW, target_block_bytes // (C * esize)))
            tn = (tn // 128) * 128
            # v7x has 2 TensorCores: avoid a degenerate (1, 1) grid.
            if B == 1 and tn >= HW and HW >= 256:
                tn = max(128, ((pl.cdiv(HW, 2) + 127) // 128) * 128)
        grid = (B, pl.cdiv(HW, tn))
        kernel = _make_spatial_kernel(has_p1)
        in_spec_x = pl.BlockSpec((1, C, tn), lambda b, n: (b, 0, n))
        out_spec = pl.BlockSpec((1, C, tn), lambda b, n: (b, 0, n))
        dim_sem = ("parallel", "parallel")

    out3d = pl.pallas_call(
        kernel,
        out_shape=jax.ShapeDtypeStruct((B, C, HW), dt),
        grid_spec=pltpu.PrefetchScalarGridSpec(
            num_scalar_prefetch=0,
            grid=grid,
            in_specs=[in_spec_x] + common_specs,
            out_specs=out_spec,
        ),
        compiler_params=pltpu.CompilerParams(
            dimension_semantics=dim_sem,
            vmem_limit_bytes=vmem_limit),
        cost_estimate=cost,
    )(x3d, A, w_eff, b_eff)

    return out3d.reshape(B, C, H, W)


# ---------------------------------------------------------------------------
# Pure-JAX reference mirroring the PyTorch forward (including the idx bug).
# ---------------------------------------------------------------------------
def hoaf_v2_ref(inp, conv2_w, conv2_b, beta2, *, num_groups, num_pow=(1, 2)):
    B, C, H, W = inp.shape
    cg = C // num_groups
    oc2 = cg * (cg + 1) // 2

    inp_c = [inp[:, i::cg, :, :] for i in range(cg)]     # each (B, G, H, W)
    output = jnp.zeros_like(inp)
    if 1 in num_pow:
        output = inp
    if 2 in num_pow:
        out_c2 = jnp.zeros((B, oc2 * num_groups, H, W), inp.dtype)
        idx = 0  # NOTE: never incremented in the original PyTorch code
        for i in range(cg):
            for j in range(i, cg):
                out_c2 = out_c2.at[:, idx::oc2, :, :].add(inp_c[i] * inp_c[j])
        conv = lax.conv_general_dilated(
            out_c2, conv2_w, window_strides=(1, 1), padding="VALID",
            feature_group_count=num_groups,
            dimension_numbers=("NCHW", "OIHW", "NCHW"),
            precision=lax.Precision.HIGHEST)
        conv = conv + conv2_b.reshape(1, C, 1, 1)
        output = output + conv * beta2
    return output


if __name__ == "__main__":
    master_key = jax.random.PRNGKey(0)

    def run_case(key, B, C, H, W, num_groups, num_pow=(1, 2)):
        cg = C // num_groups
        oc2 = cg * (cg + 1) // 2
        k1, k2, k3 = jax.random.split(key, 3)
        x = jax.random.normal(k1, (B, C, H, W), dtype=jnp.float32)
        bound = 1.0 / np.sqrt(oc2)
        conv2_w = jax.random.uniform(k2, (C, oc2, 1, 1), jnp.float32, -bound, bound)
        conv2_b = jax.random.uniform(k3, (C,), jnp.float32, -bound, bound)
        beta2 = jnp.ones((1, C, 1, 1), dtype=jnp.float32)   # nn.Parameter(ones)

        out = hoaf_v2_pallas(x, conv2_w, conv2_b, beta2,
                             num_groups=num_groups, num_pow=num_pow)
        out = jax.block_until_ready(out)
        ref = hoaf_v2_ref(x, conv2_w, conv2_b, beta2,
                          num_groups=num_groups, num_pow=num_pow)
        np.testing.assert_allclose(np.asarray(out), np.asarray(ref),
                                   rtol=1e-5, atol=1e-5)

    keys = jax.random.split(master_key, 4)
    # Batch-folded path (small spatial, multiple batch elems per grid step).
    run_case(keys[0], B=2, C=8, H=16, W=16, num_groups=2)
    # Spatial-tiled path (B=1, larger spatial -> >=2 lane tiles).
    run_case(keys[1], B=1, C=16, H=64, W=64, num_groups=4)
    # Tiny odd spatial (full-dim lane block < 128), batch-folded.
    run_case(keys[2], B=3, C=8, H=5, W=7, num_groups=2)
    # Trivial configuration: no pow-2 term -> wrapper short-circuit, no kernel.
    run_case(keys[3], B=2, C=8, H=8, W=8, num_groups=2, num_pow=(1,))

    print("KERNEL_OK")
</pallas_src>

<mosaic_0001>
module attributes {stable_mosaic.version = 11 : i64} {
  func.func @kernel(%arg0: i32, %arg1: memref<2x8x256xf32, #tpu.memory_space<vmem>>, %arg2: memref<8x8xf32, #tpu.memory_space<vmem>>, %arg3: memref<8x1xf32, #tpu.memory_space<vmem>>, %arg4: memref<8x1xf32, #tpu.memory_space<vmem>>, %arg5: memref<2x8x256xf32, #tpu.memory_space<vmem>>) attributes {dimension_semantics = [#tpu.dimension_semantics<parallel>], iteration_bounds = array<i64: 1>, scalar_prefetch = 0 : i64, scratch_operands = 0 : i64, tpu.core_type = #tpu.core_type<tc>, window_params = [{transform_indices = @transform_0, window_bounds = array<i64: 2, 8, 256>}, {pipeline_mode = #tpu.pipeline_mode<synchronous>, transform_indices = @transform_1, window_bounds = array<i64: 8, 8>}, {pipeline_mode = #tpu.pipeline_mode<synchronous>, transform_indices = @transform_2, window_bounds = array<i64: 8, 1>}, {pipeline_mode = #tpu.pipeline_mode<synchronous>, transform_indices = @transform_3, window_bounds = array<i64: 8, 1>}, {transform_indices = @transform_4, window_bounds = array<i64: 2, 8, 256>}]} {
    %c0 = arith.constant 0 : index
    %c0_0 = arith.constant 0 : index
    %0 = vector.load %arg2[%c0, %c0_0] : memref<8x8xf32, #tpu.memory_space<vmem>>, vector<8x8xf32>
    %c0_1 = arith.constant 0 : index
    %c0_2 = arith.constant 0 : index
    %1 = vector.load %arg3[%c0_1, %c0_2] : memref<8x1xf32, #tpu.memory_space<vmem>>, vector<8x1xf32>
    %c0_3 = arith.constant 0 : index
    %c0_4 = arith.constant 0 : index
    %2 = vector.load %arg4[%c0_3, %c0_4] : memref<8x1xf32, #tpu.memory_space<vmem>>, vector<8x1xf32>
    %c0_5 = arith.constant 0 : index
    %c0_6 = arith.constant 0 : index
    %c0_7 = arith.constant 0 : index
    %3 = vector.load %arg1[%c0_5, %c0_6, %c0_7] : memref<2x8x256xf32, #tpu.memory_space<vmem>>, vector<1x8x256xf32>
    %4 = vector.shape_cast %3 : vector<1x8x256xf32> to vector<8x256xf32>
    %cst = arith.constant dense<0.000000e+00> : vector<8x256xf32>
    %5 = tpu.matmul %0, %4, %cst {dimension_numbers = #tpu.dot_dimension_numbers<[1], [0], [0], [1], [0, 0, 1, 1], [], []>, precision = #tpu.contract_precision<fp32>} : vector<8x8xf32>, vector<8x256xf32>, vector<8x256xf32> -> vector<8x256xf32>
    %6 = arith.mulf %4, %4 : vector<8x256xf32>
    %cst_8 = arith.constant dense<0.000000e+00> : vector<8x256xf32>
    %7 = tpu.matmul %0, %6, %cst_8 {dimension_numbers = #tpu.dot_dimension_numbers<[1], [0], [0], [1], [0, 0, 1, 1], [], []>, precision = #tpu.contract_precision<fp32>} : vector<8x8xf32>, vector<8x256xf32>, vector<8x256xf32> -> vector<8x256xf32>
    %8 = arith.mulf %5, %5 : vector<8x256xf32>
    %9 = arith.addf %8, %7 : vector<8x256xf32>
    %cst_9 = arith.constant 5.000000e-01 : f32
    %10 = vector.broadcast %cst_9 : f32 to vector<8x256xf32>
    %11 = arith.mulf %10, %9 : vector<8x256xf32>
    %12 = vector.broadcast %1 : vector<8x1xf32> to vector<8x256xf32>
    %13 = arith.mulf %12, %11 : vector<8x256xf32>
    %14 = vector.broadcast %2 : vector<8x1xf32> to vector<8x256xf32>
    %15 = arith.addf %13, %14 : vector<8x256xf32>
    %16 = arith.addf %4, %15 : vector<8x256xf32>
    %c0_10 = arith.constant 0 : index
    %c0_11 = arith.constant 0 : index
    %c0_12 = arith.constant 0 : index
    %17 = vector.load %arg5[%c0_10, %c0_11, %c0_12] : memref<2x8x256xf32, #tpu.memory_space<vmem>>, vector<1x8x256xf32>
    %18 = vector.shape_cast %17 : vector<1x8x256xf32> to vector<8x256xf32>
    %19 = vector.shape_cast %16 : vector<8x256xf32> to vector<1x8x256xf32>
    tpu.vector_store %arg5[%c0_10, %c0_11, %c0_12], %19 {strides = array<i32>} : memref<2x8x256xf32, #tpu.memory_space<vmem>>, vector<1x8x256xf32>,
    %c1 = arith.constant 1 : index
    %c0_13 = arith.constant 0 : index
    %c0_14 = arith.constant 0 : index
    %20 = vector.load %arg1[%c1, %c0_13, %c0_14] : memref<2x8x256xf32, #tpu.memory_space<vmem>>, vector<1x8x256xf32>
    %21 = vector.shape_cast %20 : vector<1x8x256xf32> to vector<8x256xf32>
    %cst_15 = arith.constant dense<0.000000e+00> : vector<8x256xf32>
    %22 = tpu.matmul %0, %21, %cst_15 {dimension_numbers = #tpu.dot_dimension_numbers<[1], [0], [0], [1], [0, 0, 1, 1], [], []>, precision = #tpu.contract_precision<fp32>} : vector<8x8xf32>, vector<8x256xf32>, vector<8x256xf32> -> vector<8x256xf32>
    %23 = arith.mulf %21, %21 : vector<8x256xf32>
    %cst_16 = arith.constant dense<0.000000e+00> : vector<8x256xf32>
    %24 = tpu.matmul %0, %23, %cst_16 {dimension_numbers = #tpu.dot_dimension_numbers<[1], [0], [0], [1], [0, 0, 1, 1], [], []>, precision = #tpu.contract_precision<fp32>} : vector<8x8xf32>, vector<8x256xf32>, vector<8x256xf32> -> vector<8x256xf32>
    %25 = arith.mulf %22, %22 : vector<8x256xf32>
    %26 = arith.addf %25, %24 : vector<8x256xf32>
    %cst_17 = arith.constant 5.000000e-01 : f32
    %27 = vector.broadcast %cst_17 : f32 to vector<8x256xf32>
    %28 = arith.mulf %27, %26 : vector<8x256xf32>
    %29 = vector.broadcast %1 : vector<8x1xf32> to vector<8x256xf32>
    %30 = arith.mulf %29, %28 : vector<8x256xf32>
    %31 = vector.broadcast %2 : vector<8x1xf32> to vector<8x256xf32>
    %32 = arith.addf %30, %31 : vector<8x256xf32>
    %33 = arith.addf %21, %32 : vector<8x256xf32>
    %c1_18 = arith.constant 1 : index
    %c0_19 = arith.constant 0 : index
    %c0_20 = arith.constant 0 : index
    %34 = vector.load %arg5[%c1_18, %c0_19, %c0_20] : memref<2x8x256xf32, #tpu.memory_space<vmem>>, vector<1x8x256xf32>
    %35 = vector.shape_cast %34 : vector<1x8x256xf32> to vector<8x256xf32>
    %36 = vector.shape_cast %33 : vector<8x256xf32> to vector<1x8x256xf32>
    tpu.vector_store %arg5[%c1_18, %c0_19, %c0_20], %36 {strides = array<i32>} : memref<2x8x256xf32, #tpu.memory_space<vmem>>, vector<1x8x256xf32>,
    return
  }
  func.func @transform_0(%arg0: i32) -> (i32, i32, i32) {
    %c0_i32 = arith.constant 0 : i32
    %c0_i32_0 = arith.constant 0 : i32
    %c0_i32_1 = arith.constant 0 : i32
    return %arg0, %c0_i32, %c0_i32_0 : i32, i32, i32
  }
  func.func @transform_1(%arg0: i32) -> (i32, i32) {
    %c0_i32 = arith.constant 0 : i32
    %c0_i32_0 = arith.constant 0 : i32
    %c0_i32_1 = arith.constant 0 : i32
    return %c0_i32, %c0_i32_0 : i32, i32
  }
  func.func @transform_2(%arg0: i32) -> (i32, i32) {
    %c0_i32 = arith.constant 0 : i32
    %c0_i32_0 = arith.constant 0 : i32
    %c0_i32_1 = arith.constant 0 : i32
    return %c0_i32, %c0_i32_0 : i32, i32
  }
  func.func @transform_3(%arg0: i32) -> (i32, i32) {
    %c0_i32 = arith.constant 0 : i32
    %c0_i32_0 = arith.constant 0 : i32
    %c0_i32_1 = arith.constant 0 : i32
    return %c0_i32, %c0_i32_0 : i32, i32
  }
  func.func @transform_4(%arg0: i32) -> (i32, i32, i32) {
    %c0_i32 = arith.constant 0 : i32
    %c0_i32_0 = arith.constant 0 : i32
    %c0_i32_1 = arith.constant 0 : i32
    return %arg0, %c0_i32, %c0_i32_0 : i32, i32, i32
  }
}

</mosaic_0001>

<bundles_post_ra>
// kernel: tpu_custom_call.1
= control target key start
LH: loop header
LB: loop body
LE: loop exit
PB: predicated region body
PF: predicated region fallthrough
CT: control target
= control target key end

     0   :  { %9 = vsyncpa [#allocation3], 0  ;;  %s1491_s0 = inlined_call_operand.hbm [shape: f32[2,8,256], index: 0, kind: input, shape index: {}]   ;;  %s1492_s1 = inlined_call_operand.vmem [shape: f32[8,8], index: 1, kind: input, shape index: {}]   ;;  %s1493_s2 = inlined_call_operand.vmem [shape: f32[8,1], index: 2, kind: input, shape index: {}]   ;;  %s1494_s3 = inlined_call_operand.vmem [shape: f32[8,1], index: 3, kind: input, shape index: {}]   ;;  %s1495_s4 = inlined_call_operand.hbm [shape: f32[2,8,256], index: 4, kind: output, shape index: {}]  }
   0x1   :  { %10 = vsyncpa [#allocation4], 0  ;;  %s15_s17 = sshll.u32 %s1491_s0, 4  ;;  %s1334_s18 = smov [#allocation2]   ;;  %s16_s17 = int_to_ptr.hbm [resolvable:$true] %s15_s17 }
   0x2   :  { %s17_s19 = sshll.u32 %s1334_s18, 4  ;;  %s1335_s20 = smov 256   ;;  %s18_s19 = int_to_ptr.vmem [resolvable:$true] %s17_s19 }
   0x3   :  { %s1336_s21 = smov 16  }
   0x4   :  { %23 = dma.hbm_to_vmem [thread:$0]  %s16_s17, 512, %s18_s19, [#allocation3], %s1335_s20, %s1335_s20, %s1336_s21  }
   0x5   :  { %1330 = dma.done.wait [#allocation3], 512  }
   0x6   :  { %1331 = vsyncadd [#allocation3], 4294966784  ;;  %vm39_vm0 = vcmask 64512   ;;  %v1370_v0 = vld [vmem:[#allocation2] sm:$0xff]  ;;  %v1375_v2 = vld [vmem:[#allocation2 + $0x8] sm:$0xff]  ;;  %v1337_v32 = vmov 0  }
   0x7   :  { %v34_v1 = vld [vmem:[%s1492_s1] sm:$0xff]  ;;  %v58_v3 = vand.u32 4294901760, %v1370_v0  ;;  %v204_v5 = vand.u32 4294901760, %v1375_v2  ;;  %v335_v6 = vmul.f32 %v1370_v0, %v1370_v0  ;;  %v336_v8 = vmul.f32 %v1375_v2, %v1375_v2  ;;  %v1409_v31 = vld [vmem:[#allocation2 + $0x10] sm:$0xff]  ;;  %1281 = vset.pattern.permute.xlu0 %v1337_v32  ;;  %v1417_v35 = vld [vmem:[#allocation2 + $0x18] sm:$0xff]  ;;  %s1263_s28 = sshll.u32 %s1495_s4, 4  ;;  %s1264_s28 = int_to_ptr.hbm [resolvable:$true] %s1263_s28 }
   0x8   :  { %v41_v4 = vsel %vm39_vm0, %v34_v1, 0  ;;  %v35_v33 = vld [vmem:[%s1493_s2] sm:$0xff]  ;;  %v671_v34 = vand.u32 4294901760, %v1409_v31  ;;  %v817_v37 = vand.u32 4294901760, %v1417_v35  ;;  %v948_v46 = vmul.f32 %v1409_v31, %v1409_v31 }
   0x9   :  { %v1381_v7 = vand.u32 4294901760, %v41_v4  ;;  %v85_v9 = vsub.f32 %v1370_v0, %v58_v3  ;;  %135 = vmatpush.msra.mxu3 %v58_v3  ;;  %59 = vmatpush.msra.mxu0 %v58_v3  ;;  %v231_v10 = vsub.f32 %v1375_v2, %v204_v5  ;;  %v352_v11 = vand.u32 4294901760, %v335_v6  ;;  %v36_v38 = vld [vmem:[%s1494_s3] sm:$0xff]  ;;  %s1338_s3 = smov [#allocation5]  }
   0xa   :  { %v1390_v16 = vand.u32 4294901760, %v336_v8  ;;  %637 = vperm.xlu0 %1281, %v35_v33   ;;  %v698_v36 = vsub.f32 %v1409_v31, %v671_v34  ;;  %v844_v40 = vsub.f32 %v1417_v35, %v817_v37  ;;  %v965_v47 = vand.u32 4294901760, %v948_v46  ;;  %s1261_s25 = sshll.u32 %s1338_s3, 4  ;;  %s1262_s25 = int_to_ptr.vmem [resolvable:$true] %s1261_s25 }
   0xb   :  { %v1388_v12 = vsub.f32 %v41_v4, %v1381_v7  ;;  %112 = vmatpush.msra.mxu2 %v85_v9  ;;  %v86_v13 = vand.u32 4294901760, %v85_v9  ;;  %v232_v14 = vand.u32 4294901760, %v231_v10  ;;  %v379_v15 = vsub.f32 %v335_v6, %v352_v11 }
   0xc   :  { %v525_v24 = vsub.f32 %v336_v8, %v1390_v16  ;;  %v699_v39 = vand.u32 4294901760, %v698_v36  ;;  %v845_v42 = vand.u32 4294901760, %v844_v40  ;;  %v949_v48 = vmul.f32 %v1417_v35, %v1417_v35 }
   0xd   :  { %115 = vmatmul.f32.vlgmr.msra.gmra.mxu2 %v1388_v12  ;;  %v1394_v17 = vand.u32 4294901760, %v1388_v12  ;;  %v87_v18 = vsub.f32 %v85_v9, %v86_v13  ;;  %161 = vmatpush.msrb.mxu0 %v86_v13  ;;  %v233_v19 = vsub.f32 %v231_v10, %v232_v14  ;;  %v380_v23 = vand.u32 4294901760, %v379_v15 }
   0xe   :  { %205 = vmatpush.msrb.mxu2 %v204_v5  ;;  %v526_v27 = vand.u32 4294901760, %v525_v24  ;;  %v700_v41 = vsub.f32 %v698_v36, %v699_v39  ;;  %v846_v44 = vsub.f32 %v844_v40, %v845_v42  ;;  %v992_v49 = vsub.f32 %v948_v46, %v965_v47 }
   0xf   :  { %139 = vmatmul.f32.vlgmr.msra.gmra.mxu3 %v1394_v17  ;;  %v63_v20 = vsub.f32 %v1388_v12, %v1394_v17  ;;  %v88_v21 = vand.u32 4294901760, %v87_v18  ;;  %v234_v22 = vand.u32 4294901760, %v233_v19  ;;  %v381_v26 = vsub.f32 %v379_v15, %v380_v23 }
  0x10   :  { %307 = vmatpush.msra.mxu2 %v232_v14  ;;  %v527_v29 = vsub.f32 %v525_v24, %v526_v27  ;;  %v701_v43 = vand.u32 4294901760, %v700_v41  ;;  %v847_v45 = vand.u32 4294901760, %v846_v44  ;;  %v1111_v50 = vand.u32 4294901760, %v949_v48 }
  0x11   :  { %v1400_v25 = vand.u32 4294901760, %v63_v20  ;;  %89 = vmatpush.msra.mxu1 %v88_v21  ;;  %235 = vmatpush.msrb.mxu3 %v234_v22  ;;  %v382_v28 = vand.u32 4294901760, %v381_v26  ;;  %v993_v51 = vand.u32 4294901760, %v992_v49 }
  0x12   :  { %91 = vmatmul.f32.vlgmr.msra.gmra.mxu1 %v1381_v7  ;;  %v528_v30 = vand.u32 4294901760, %v527_v29  ;;  %644 = vperm.xlu0 %1281, %v36_v38   ;;  %v1138_v52 = vsub.f32 %v949_v48, %v1111_v50 }
  0x13   :  { %65 = vmatmul.f32.vlgmr.msra.gmra.mxu0 %v1400_v25  ;;  %183 = vmatpush.msrb.mxu1 %v58_v3  ;;  %v994_v53 = vsub.f32 %v992_v49, %v993_v51 }
  0x14   :  { %258 = vmatpush.msra.mxu0 %v231_v10  ;;  %329 = vmatpush.msra.mxu3 %v204_v5  ;;  %v1139_v54 = vand.u32 4294901760, %v1138_v52 }
  0x15   :  { %211 = vmatmul.f32.vlgmr.msrb.gmra.mxu2 %v1400_v25  ;;  %281 = vmatpush.msra.mxu1 %v204_v5  ;;  %v995_v55 = vand.u32 4294901760, %v994_v53 }
  0x16   :  { %406 = vmatpush.msrb.mxu2 %v379_v15  ;;  %v1140_v56 = vsub.f32 %v1138_v52, %v1139_v54 }
  0x17   :  { %237 = vmatmul.f32.vlgmr.msrb.gmra.mxu3 %v1381_v7 }
  0x18   :  { %429 = vmatpush.msrb.mxu3 %v352_v11  ;;  %v1141_v57 = vand.u32 4294901760, %v1140_v56 }
  0x1a   :  { %185 = vmatmul.f32.vlgmr.msrb.gmra.mxu1 %v1381_v7 }
  0x1b   :  { %163 = vmatmul.f32.vlgmr.msrb.gmra.mxu0 %v1381_v7  ;;  %383 = vmatpush.msrb.mxu1 %v382_v28 }
  0x1c   :  { %353 = vmatpush.msrb.mxu0 %v352_v11 }
  0x1d   :  { %309 = vmatmul.f32.vlgmr.msra.gmra.mxu2 %v1381_v7 }
  0x1e   :  { %499 = vmatpush.msra.mxu2 %v1390_v16 }
  0x1f   :  { %331 = vmatmul.f32.vlgmr.msra.gmra.mxu3 %v1381_v7 }
  0x20   :  { %529 = vmatpush.msra.mxu3 %v528_v30 }
  0x22   :  { %285 = vmatmul.f32.vlgmr.msra.gmra.mxu1 %v1394_v17 }
  0x23   :  { %261 = vmatmul.f32.vlgmr.msra.gmra.mxu0 %v1388_v12  ;;  %477 = vmatpush.msra.mxu1 %v352_v11 }
  0x24   :  { %455 = vmatpush.msra.mxu0 %v380_v23 }
  0x25   :  { %409 = vmatmul.f32.vlgmr.msrb.gmra.mxu2 %v1388_v12 }
  0x26   :  { %601 = vmatpush.msrb.mxu2 %v526_v27 }
  0x27   :  { %433 = vmatmul.f32.vlgmr.msrb.gmra.mxu3 %v1394_v17 }
  0x28   :  { %623 = vmatpush.msrb.mxu3 %v1390_v16 }
  0x2a   :  { %385 = vmatmul.f32.vlgmr.msrb.gmra.mxu1 %v1381_v7 }
  0x2b   :  { %359 = vmatmul.f32.vlgmr.msrb.gmra.mxu0 %v1400_v25  ;;  %575 = vmatpush.msrb.mxu1 %v1390_v16 }
  0x2c   :  { %552 = vmatpush.msrb.mxu0 %v525_v24 }
  0x2d   :  { %505 = vmatmul.f32.vlgmr.msra.gmra.mxu2 %v1400_v25 }
  0x2e   :  { %725 = vmatpush.msra.mxu2 %v698_v36 }
  0x2f   :  { %531 = vmatmul.f32.vlgmr.msra.gmra.mxu3 %v1381_v7 }
  0x30   :  { %748 = vmatpush.msra.mxu3 %v671_v34 }
  0x32   :  { %479 = vmatmul.f32.vlgmr.msra.gmra.mxu1 %v1381_v7 }
  0x33   :  { %457 = vmatmul.f32.vlgmr.msra.gmra.mxu0 %v1381_v7  ;;  %702 = vmatpush.msra.mxu1 %v701_v43 }
  0x34   :  { %672 = vmatpush.msra.mxu0 %v671_v34 }
  0x35   :  { %603 = vmatmul.f32.vlgmr.msrb.gmra.mxu2 %v1381_v7 }
  0x36   :  { %818 = vmatpush.msrb.mxu2 %v817_v37 }
  0x37   :  { %625 = vmatmul.f32.vlgmr.msrb.gmra.mxu3 %v1381_v7 }
  0x38   :  { %848 = vmatpush.msrb.mxu3 %v847_v45 }
  0x3a   :  { %579 = vmatmul.f32.vlgmr.msrb.gmra.mxu1 %v1394_v17 }
  0x3b   :  { %555 = vmatmul.f32.vlgmr.msrb.gmra.mxu0 %v1388_v12  ;;  %796 = vmatpush.msrb.mxu1 %v671_v34 }
  0x3c   :  { %774 = vmatpush.msrb.mxu0 %v699_v39 }
  0x3d   :  { %728 = vmatmul.f32.vlgmr.msra.gmra.mxu2 %v1388_v12 }
  0x3e   :  { %920 = vmatpush.msra.mxu2 %v845_v42 }
  0x3f   :  { %752 = vmatmul.f32.vlgmr.msra.gmra.mxu3 %v1394_v17 }
  0x40   :  { %942 = vmatpush.msra.mxu3 %v817_v37 }
  0x42   :  { %704 = vmatmul.f32.vlgmr.msra.gmra.mxu1 %v1381_v7 }
  0x43   :  { %678 = vmatmul.f32.vlgmr.msra.gmra.mxu0 %v1400_v25  ;;  %894 = vmatpush.msra.mxu1 %v817_v37 }
  0x44   :  { %871 = vmatpush.msra.mxu0 %v844_v40 }
  0x45   :  { %824 = vmatmul.f32.vlgmr.msrb.gmra.mxu2 %v1400_v25 }
  0x46   :  { %1019 = vmatpush.msrb.mxu2 %v992_v49 }
  0x47   :  { %850 = vmatmul.f32.vlgmr.msrb.gmra.mxu3 %v1381_v7 }
  0x48   :  { %1042 = vmatpush.msrb.mxu3 %v965_v47 }
  0x4a   :  { %798 = vmatmul.f32.vlgmr.msrb.gmra.mxu1 %v1381_v7 }
  0x4b   :  { %776 = vmatmul.f32.vlgmr.msrb.gmra.mxu0 %v1381_v7  ;;  %996 = vmatpush.msrb.mxu1 %v995_v55 }
  0x4c   :  { %966 = vmatpush.msrb.mxu0 %v965_v47 }
  0x4d   :  { %922 = vmatmul.f32.vlgmr.msra.gmra.mxu2 %v1381_v7 }
  0x4e   :  { %1112 = vmatpush.msra.mxu2 %v1111_v50 }
  0x4f   :  { %944 = vmatmul.f32.vlgmr.msra.gmra.mxu3 %v1381_v7 }
  0x50   :  { %1142 = vmatpush.msra.mxu3 %v1141_v57 }
  0x52   :  { %898 = vmatmul.f32.vlgmr.msra.gmra.mxu1 %v1394_v17 }
  0x53   :  { %874 = vmatmul.f32.vlgmr.msra.gmra.mxu0 %v1388_v12  ;;  %1090 = vmatpush.msra.mxu1 %v965_v47 }
  0x54   :  { %1068 = vmatpush.msra.mxu0 %v993_v51 }
  0x55   :  { %1022 = vmatmul.f32.vlgmr.msrb.gmra.mxu2 %v1388_v12 }
  0x56   :  { %1214 = vmatpush.msrb.mxu2 %v1139_v54 }
  0x57   :  { %1046 = vmatmul.f32.vlgmr.msrb.gmra.mxu3 %v1394_v17 }
  0x58   :  { %1236 = vmatpush.msrb.mxu3 %v1111_v50 }
  0x5a   :  { %998 = vmatmul.f32.vlgmr.msrb.gmra.mxu1 %v1381_v7 }
  0x5b   :  { %972 = vmatmul.f32.vlgmr.msrb.gmra.mxu0 %v1400_v25  ;;  %1188 = vmatpush.msrb.mxu1 %v1111_v50 }
  0x5c   :  { %1165 = vmatpush.msrb.mxu0 %v1138_v52 }
  0x5d   :  { %1118 = vmatmul.f32.vlgmr.msra.gmra.mxu2 %v1400_v25 }
  0x5f   :  { %1144 = vmatmul.f32.vlgmr.msra.gmra.mxu3 %v1381_v7 }
  0x62   :  { %1092 = vmatmul.f32.vlgmr.msra.gmra.mxu1 %v1381_v7 }
  0x63   :  { %1070 = vmatmul.f32.vlgmr.msra.gmra.mxu0 %v1381_v7 }
  0x65   :  { %1216 = vmatmul.f32.vlgmr.msrb.gmra.mxu2 %v1381_v7 }
  0x67   :  { %1238 = vmatmul.f32.vlgmr.msrb.gmra.mxu3 %v1381_v7 }
  0x6a   :  { %1192 = vmatmul.f32.vlgmr.msrb.gmra.mxu1 %v1394_v17 }
  0x6b   :  { %1168 = vmatmul.f32.vlgmr.msrb.gmra.mxu0 %v1388_v12 }
  0x7c   :  { %v1469_v19 = vpop.permute.xlu0 %637 }
  0x84   :  { %v1471_v37 = vpop.permute.xlu0 %644 }
  0x8f   :  { %v92_v59 = vpop.f32.mrf.mxu1 }
  0x90   :  { %v66_v58 = vpop.f32.mrf.mxu0  ;;  %v116_v60 = vpop.f32.mrf.mxu2 }
  0x91   :  { %v93_v6 = vadd.f32 %v92_v59, %v66_v58 }
  0x92   :  { %v140_v61 = vpop.f32.mrf.mxu3 }
  0x93   :  { %v117_v10 = vadd.f32 %v116_v60, %v93_v6 }
  0x95   :  { %v141_v13 = vadd.f32 %v140_v61, %v117_v10 }
  0x97   :  { %v186_v63 = vpop.f32.mrf.mxu1 }
  0x98   :  { %v164_v62 = vpop.f32.mrf.mxu0  ;;  %v212_v1 = vpop.f32.mrf.mxu2 }
  0x99   :  { %v165_v16 = vadd.f32 %v164_v62, %v141_v13 }
  0x9a   :  { %v238_v3 = vpop.f32.mrf.mxu3 }
  0x9b   :  { %v239_v18 = vadd.f32 %v238_v3, %v212_v1  ;;  %v187_v20 = vadd.f32 %v186_v63, %v165_v16 }
  0x9d   :  { %v629_v28 = vmul.f32 %v187_v20, %v187_v20 }
  0x9f   :  { %v286_v5 = vpop.f32.mrf.mxu1 }
  0xa0   :  { %v262_v4 = vpop.f32.mrf.mxu0  ;;  %v310_v8 = vpop.f32.mrf.mxu2 }
  0xa1   :  { %v263_v21 = vadd.f32 %v262_v4, %v239_v18 }
  0xa2   :  { %v332_v9 = vpop.f32.mrf.mxu3 }
  0xa3   :  { %v287_v29 = vadd.f32 %v286_v5, %v263_v21 }
  0xa5   :  { %v311_v33 = vadd.f32 %v310_v8, %v287_v29 }
  0xa7   :  { %v386_v7 = vpop.f32.mrf.mxu1  ;;  %v333_v44 = vadd.f32 %v332_v9, %v311_v33 }
  0xa8   :  { %v360_v11 = vpop.f32.mrf.mxu0  ;;  %v410_v14 = vpop.f32.mrf.mxu2 }
  0xa9   :  { %v387_v12 = vadd.f32 %v386_v7, %v360_v11  ;;  %v630_v49 = vmul.f32 %v333_v44, %v333_v44 }
  0xaa   :  { %v434_v15 = vpop.f32.mrf.mxu3 }
  0xab   :  { %v411_v17 = vadd.f32 %v410_v14, %v387_v12 }
  0xad   :  { %v435_v22 = vadd.f32 %v434_v15, %v411_v17 }
  0xaf   :  { %v480_v24 = vpop.f32.mrf.mxu1 }
  0xb0   :  { %v458_v23 = vpop.f32.mrf.mxu0  ;;  %v506_v26 = vpop.f32.mrf.mxu2 }
  0xb1   :  { %v459_v25 = vadd.f32 %v458_v23, %v435_v22 }
  0xb2   :  { %v532_v27 = vpop.f32.mrf.mxu3 }
  0xb3   :  { %v481_v30 = vadd.f32 %v480_v24, %v459_v25  ;;  %v533_v36 = vadd.f32 %v532_v27, %v506_v26 }
  0xb5   :  { %v631_v32 = vadd.f32 %v629_v28, %v481_v30 }
  0xb7   :  { %v633_v34 = vmul.f32 0.5, %v631_v32  ;;  %v580_v39 = vpop.f32.mrf.mxu1 }
  0xb8   :  { %v556_v38 = vpop.f32.mrf.mxu0  ;;  %v604_v42 = vpop.f32.mrf.mxu2 }
  0xb9   :  { %v557_v40 = vadd.f32 %v556_v38, %v533_v36  ;;  %v640_v41 = vmul.f32 %v1469_v19, %v633_v34 }
  0xba   :  { %v626_v43 = vpop.f32.mrf.mxu3 }
  0xbb   :  { %v581_v45 = vadd.f32 %v580_v39, %v557_v40  ;;  %v647_v46 = vadd.f32 %v1471_v37, %v640_v41 }
  0xbd   :  { %v649_v47 = vadd.f32 %v647_v46, %v1370_v0  ;;  %v605_v48 = vadd.f32 %v604_v42, %v581_v45 }
  0xbf   :  { %651 = vst [vmem:[#allocation5] sm:$0xff] %v649_v47  ;;  %v627_v50 = vadd.f32 %v626_v43, %v605_v48  ;;  %v705_v52 = vpop.f32.mrf.mxu1 }
  0xc0   :  { %v679_v51 = vpop.f32.mrf.mxu0  ;;  %v729_v54 = vpop.f32.mrf.mxu2 }
  0xc1   :  { %v632_v53 = vadd.f32 %v630_v49, %v627_v50  ;;  %v706_v3 = vadd.f32 %v705_v52, %v679_v51 }
  0xc2   :  { %v753_v55 = vpop.f32.mrf.mxu3 }
  0xc3   :  { %v634_v56 = vmul.f32 0.5, %v632_v53  ;;  %v730_v6 = vadd.f32 %v729_v54, %v706_v3 }
  0xc5   :  { %v641_v57 = vmul.f32 %v1469_v19, %v634_v56  ;;  %v754_v10 = vadd.f32 %v753_v55, %v730_v6 }
  0xc7   :  { %v648_v58 = vadd.f32 %v1471_v37, %v641_v57  ;;  %v799_v60 = vpop.f32.mrf.mxu1 }
  0xc8   :  { %v777_v59 = vpop.f32.mrf.mxu0  ;;  %v825_v62 = vpop.f32.mrf.mxu2 }
  0xc9   :  { %v650_v61 = vadd.f32 %v648_v58, %v1375_v2  ;;  %v778_v12 = vadd.f32 %v777_v59, %v754_v10 }
  0xca   :  { %v851_v0 = vpop.f32.mrf.mxu3 }
  0xcb   :  { %652 = vst [vmem:[#allocation5 + $0x8] sm:$0xff] %v650_v61  ;;  %v852_v15 = vadd.f32 %v851_v0, %v825_v62  ;;  %v800_v16 = vadd.f32 %v799_v60, %v778_v12 }
  0xcd   :  { %v1242_v23 = vmul.f32 %v800_v16, %v800_v16 }
  0xcf   :  { %v899_v1 = vpop.f32.mrf.mxu1 }
  0xd0   :  { %v875_v63 = vpop.f32.mrf.mxu0  ;;  %v923_v4 = vpop.f32.mrf.mxu2 }
  0xd1   :  { %v876_v2 = vadd.f32 %v875_v63, %v852_v15 }
  0xd2   :  { %v945_v5 = vpop.f32.mrf.mxu3 }
  0xd3   :  { %v900_v24 = vadd.f32 %v899_v1, %v876_v2 }
  0xd5   :  { %v924_v28 = vadd.f32 %v923_v4, %v900_v24 }
  0xd7   :  { %v999_v9 = vpop.f32.mrf.mxu1  ;;  %v946_v39 = vadd.f32 %v945_v5, %v924_v28 }
  0xd8   :  { %v973_v8 = vpop.f32.mrf.mxu0  ;;  %v1023_v7 = vpop.f32.mrf.mxu2 }
  0xd9   :  { %v1000_v11 = vadd.f32 %v999_v9, %v973_v8  ;;  %v1243_v45 = vmul.f32 %v946_v39, %v946_v39 }
  0xda   :  { %v1047_v13 = vpop.f32.mrf.mxu3 }
  0xdb   :  { %v1024_v14 = vadd.f32 %v1023_v7, %v1000_v11 }
  0xdd   :  { %v1048_v17 = vadd.f32 %v1047_v13, %v1024_v14 }
  0xdf   :  { %v1093_v20 = vpop.f32.mrf.mxu1 }
  0xe0   :  { %v1071_v18 = vpop.f32.mrf.mxu0  ;;  %v1119_v22 = vpop.f32.mrf.mxu2 }
  0xe1   :  { %v1072_v21 = vadd.f32 %v1071_v18, %v1048_v17 }
  0xe2   :  { %v1145_v26 = vpop.f32.mrf.mxu3 }
  0xe3   :  { %v1094_v25 = vadd.f32 %v1093_v20, %v1072_v21  ;;  %v1146_v30 = vadd.f32 %v1145_v26, %v1119_v22 }
  0xe5   :  { %v1244_v27 = vadd.f32 %v1242_v23, %v1094_v25 }
  0xe7   :  { %v1246_v29 = vmul.f32 0.5, %v1244_v27  ;;  %v1193_v33 = vpop.f32.mrf.mxu1 }
  0xe8   :  { %v1169_v32 = vpop.f32.mrf.mxu0  ;;  %v1217_v38 = vpop.f32.mrf.mxu2 }
  0xe9   :  { %v1248_v34 = vmul.f32 %v1246_v29, %v1469_v19  ;;  %v1170_v36 = vadd.f32 %v1169_v32, %v1146_v30 }
  0xea   :  { %v1239_v42 = vpop.f32.mrf.mxu3 }
  0xeb   :  { %v1250_v40 = vadd.f32 %v1248_v34, %v1471_v37  ;;  %v1194_v41 = vadd.f32 %v1193_v33, %v1170_v36 }
  0xed   :  { %v1252_v43 = vadd.f32 %v1250_v40, %v1409_v31  ;;  %v1218_v44 = vadd.f32 %v1217_v38, %v1194_v41 }
  0xef   :  { %1255 = vst [vmem:[#allocation5 + $0x10] sm:$0xff] %v1252_v43  ;;  %v1240_v46 = vadd.f32 %v1239_v42, %v1218_v44 }
  0xf1   :  { %v1245_v47 = vadd.f32 %v1243_v45, %v1240_v46 }
  0xf3   :  { %v1247_v48 = vmul.f32 0.5, %v1245_v47 }
  0xf5   :  { %v1249_v49 = vmul.f32 %v1247_v48, %v1469_v19 }
  0xf7   :  { %v1251_v50 = vadd.f32 %v1249_v49, %v1471_v37 }
  0xf9   :  { %v1253_v51 = vadd.f32 %v1251_v50, %v1417_v35 }
  0xfb   :  { %1256 = vst [vmem:[#allocation5 + $0x18] sm:$0xff] %v1253_v51 }
  0xfc   :  { %1269 = dma.vmem_to_hbm [thread:$0]  %s1262_s25, 512, %s1264_s28, [#allocation4], %s1335_s20, %s1335_s20, %s1336_s21  }
  0xfd   :  { %1332 = dma.done.wait [#allocation4], 512  }
  0xfe   :  { %1333 = vsyncadd [#allocation4], 4294966784 }
  0xff   :  { %1274 = vsyncpa [#allocation3], 1 }
 0x100   :  { %1275 = vsyncpa [#allocation4], 1 }

</bundles_post_ra>
